<compile_context>
chip_gen: v6e
topology: v6e:2x2x1
jax: 0.10.0
libtpu: 0.0.40
codegen_flags: <defaults>
</compile_context>

<pallas_src>
import functools

import jax
import jax.numpy as jnp
from jax.experimental import pallas as pl
from jax.experimental.pallas import tpu as pltpu

LEAKY_SLOPE = 0.01  # nn.LeakyReLU default negative_slope
LANE = 128


def bert_classifier_kernel(x_ref, w_ref, b_ref, o_ref):
    # LeakyReLU in f32 on the VPU (v5e has no bf16 VALU).
    x = x_ref[...].astype(jnp.float32)
    x = jnp.where(x >= 0, x, LEAKY_SLOPE * x)
    # Dropout: identity at inference.
    # TODO(synk): training-mode dropout (pltpu.prng_*) not implemented.
    # Single fused matmul on the MXU: [tb, D_in] @ [D_in, O_pad] (+ bias).
    x = x.astype(w_ref.dtype)
    y = jnp.dot(x, w_ref[...], preferred_element_type=jnp.float32) + b_ref[...]
    o_ref[...] = y.astype(o_ref.dtype)


def prepare_bert_classifier_params(w1, b1, w2, b2, *, compute_dtype=None):
    """One-time weight prep (PyTorch [out, in] convention in).

    Returns (w_fused_padded [D_in, O_pad], b_fused_padded [1, O_pad], O).
    """
    H, D_in = w1.shape
    O, H2 = w2.shape
    assert H == H2
    w1t = w1.T.astype(jnp.float32)          # [D_in, H]
    w2t = w2.T.astype(jnp.float32)          # [H, O]
    w_fused = w1t @ w2t                      # [D_in, O]   (exact fusion)
    b_fused = b1.astype(jnp.float32) @ w2t + b2.astype(jnp.float32)  # [O]

    # Lane-dense output: pad O up to a multiple of 128.
    O_pad = pl.cdiv(O, LANE) * LANE
    w_fused = jnp.pad(w_fused, ((0, 0), (0, O_pad - O)))
    b_fused = jnp.pad(b_fused, (0, O_pad - O)).reshape(1, O_pad)

    if compute_dtype is not None:
        w_fused = w_fused.astype(compute_dtype)   # bf16 on v6e/v7x halves DMA bytes
    # Bias stays f32 (added to the f32 MXU accumulator).
    return w_fused, b_fused, O


def bert_classifier_forward(x, w_fused, b_fused, out_dim, *, tb=None):
    """x: [B, D_in]; w_fused: [D_in, O_pad]; b_fused: [1, O_pad]."""
    B, D_in = x.shape
    D_in_w, O_pad = w_fused.shape
    assert D_in == D_in_w

    # Batch tile: single grid step for small B; >=2 parallel 512-row tiles at
    # large B (keeps v7x's 2nd TensorCore busy via dimension_semantics).
    if tb is None:
        tb = B if B <= 1024 else 512
    tb = max(8, ((tb + 7) // 8) * 8)        # sublane-aligned tile
    B_pad = pl.cdiv(B, tb) * tb
    if B_pad != B:
        x = jnp.pad(x, ((0, B_pad - B), (0, 0)))   # masked tail via zero-pad

    grid = (B_pad // tb,)

    itemsize = jnp.dtype(x.dtype).itemsize
    cost = pl.CostEstimate(
        flops=2 * B_pad * D_in * O_pad + 2 * B_pad * D_in,
        transcendentals=0,
        bytes_accessed=(
            B_pad * D_in * itemsize
            + w_fused.size * jnp.dtype(w_fused.dtype).itemsize
            + b_fused.size * 4
            + B_pad * O_pad * itemsize
        ),
    )

    out = pl.pallas_call(
        bert_classifier_kernel,
        out_shape=jax.ShapeDtypeStruct((B_pad, O_pad), x.dtype),
        grid_spec=pltpu.PrefetchScalarGridSpec(
            num_scalar_prefetch=0,
            grid=grid,
            in_specs=[
                pl.BlockSpec((tb, D_in), lambda i: (i, 0)),     # x tile
                pl.BlockSpec((D_in, O_pad), lambda i: (0, 0)),  # fused W (resident)
                pl.BlockSpec((1, O_pad), lambda i: (0, 0)),     # fused bias
            ],
            out_specs=pl.BlockSpec((tb, O_pad), lambda i: (i, 0)),  # lane-dense
        ),
        compiler_params=pltpu.CompilerParams(
            dimension_semantics=("parallel",),
        ),
        cost_estimate=cost,
    )(x, w_fused, b_fused)

    return out[:B, :out_dim]


def reference_forward(x, w1, b1, w2, b2):
    h = jnp.where(x >= 0, x, LEAKY_SLOPE * x)
    h = h @ w1.T + b1
    return h @ w2.T + b2


if __name__ == "__main__":
    # Small model-param choices (mp.c_input_dims, mp.c_hidden_dims, mp.c_output_dims)
    B, D_IN, HID, OUT = 16, 32, 64, 8

    key = jax.random.PRNGKey(0)
    kx, kw1, kw2 = jax.random.split(key, 3)

    x = jax.random.normal(kx, (B, D_IN), dtype=jnp.float32)

    # init_bert_weights: Linear weights ~ N(0, 0.02), biases zero.
    w1 = 0.02 * jax.random.normal(kw1, (HID, D_IN), dtype=jnp.float32)
    b1 = jnp.zeros((HID,), dtype=jnp.float32)
    w2 = 0.02 * jax.random.normal(kw2, (OUT, HID), dtype=jnp.float32)
    b2 = jnp.zeros((OUT,), dtype=jnp.float32)

    # One-time weight preparation (hoisted out of the per-call path).
    # compute_dtype=jnp.bfloat16 is the fast path on v6e/v7x; f32 kept here so
    # the tight allclose check below passes.
    w_fused, b_fused, out_dim = prepare_bert_classifier_params(
        w1, b1, w2, b2, compute_dtype=None
    )

    fwd = jax.jit(functools.partial(bert_classifier_forward, out_dim=out_dim))
    out = fwd(x, w_fused, b_fused)
    out = jax.block_until_ready(out)

    ref = reference_forward(x, w1, b1, w2, b2)
    assert out.shape == (B, OUT)
    assert jnp.allclose(out, ref, atol=1e-5, rtol=1e-5)

    print("KERNEL_OK")
</pallas_src>

<mosaic_0001>
module attributes {stable_mosaic.version = 11 : i64} {
  func.func @bert_classifier_kernel(%arg0: i32, %arg1: memref<16x32xf32, #tpu.memory_space<vmem>>, %arg2: memref<32x128xf32, #tpu.memory_space<vmem>>, %arg3: memref<1x128xf32, #tpu.memory_space<vmem>>, %arg4: memref<16x128xf32, #tpu.memory_space<vmem>>) attributes {dimension_semantics = [#tpu.dimension_semantics<parallel>], iteration_bounds = array<i64: 1>, scalar_prefetch = 0 : i64, scratch_operands = 0 : i64, tpu.core_type = #tpu.core_type<tc>, window_params = [{transform_indices = @transform_0, window_bounds = array<i64: 16, 32>}, {pipeline_mode = #tpu.pipeline_mode<synchronous>, transform_indices = @transform_1, window_bounds = array<i64: 32, 128>}, {pipeline_mode = #tpu.pipeline_mode<synchronous>, transform_indices = @transform_2, window_bounds = array<i64: 1, 128>}, {transform_indices = @transform_3, window_bounds = array<i64: 16, 128>}]} {
    %c0 = arith.constant 0 : index
    %c0_0 = arith.constant 0 : index
    %0 = vector.load %arg1[%c0, %c0_0] : memref<16x32xf32, #tpu.memory_space<vmem>>, vector<16x32xf32>
    %cst = arith.constant 0.000000e+00 : f32
    %1 = vector.broadcast %cst : f32 to vector<16x32xf32>
    %2 = arith.cmpf oge, %0, %1 : vector<16x32xf32>
    %cst_1 = arith.constant 0.00999999977 : f32
    %3 = vector.broadcast %cst_1 : f32 to vector<16x32xf32>
    %4 = arith.mulf %3, %0 : vector<16x32xf32>
    %5 = arith.select %2, %0, %4 : vector<16x32xi1>, vector<16x32xf32>
    %c0_2 = arith.constant 0 : index
    %c0_3 = arith.constant 0 : index
    %6 = vector.load %arg2[%c0_2, %c0_3] : memref<32x128xf32, #tpu.memory_space<vmem>>, vector<32x128xf32>
    %cst_4 = arith.constant dense<0.000000e+00> : vector<16x128xf32>
    %7 = tpu.matmul %5, %6, %cst_4 {dimension_numbers = #tpu.dot_dimension_numbers<[1], [0], [0], [1], [0, 0, 1, 1], [], []>} : vector<16x32xf32>, vector<32x128xf32>, vector<16x128xf32> -> vector<16x128xf32>
    %c0_5 = arith.constant 0 : index
    %c0_6 = arith.constant 0 : index
    %8 = vector.load %arg3[%c0_5, %c0_6] : memref<1x128xf32, #tpu.memory_space<vmem>>, vector<1x128xf32>
    %9 = vector.broadcast %8 : vector<1x128xf32> to vector<16x128xf32>
    %10 = arith.addf %7, %9 : vector<16x128xf32>
    %c0_7 = arith.constant 0 : index
    %c0_8 = arith.constant 0 : index
    %11 = vector.load %arg4[%c0_7, %c0_8] : memref<16x128xf32, #tpu.memory_space<vmem>>, vector<16x128xf32>
    tpu.vector_store %arg4[%c0_7, %c0_8], %10 {strides = array<i32>} : memref<16x128xf32, #tpu.memory_space<vmem>>, vector<16x128xf32>,
    return
  }
  func.func @transform_0(%arg0: i32) -> (i32, i32) {
    %c0_i32 = arith.constant 0 : i32
    %c0_i32_0 = arith.constant 0 : i32
    return %arg0, %c0_i32 : i32, i32
  }
  func.func @transform_1(%arg0: i32) -> (i32, i32) {
    %c0_i32 = arith.constant 0 : i32
    %c0_i32_0 = arith.constant 0 : i32
    %c0_i32_1 = arith.constant 0 : i32
    return %c0_i32, %c0_i32_0 : i32, i32
  }
  func.func @transform_2(%arg0: i32) -> (i32, i32) {
    %c0_i32 = arith.constant 0 : i32
    %c0_i32_0 = arith.constant 0 : i32
    %c0_i32_1 = arith.constant 0 : i32
    return %c0_i32, %c0_i32_0 : i32, i32
  }
  func.func @transform_3(%arg0: i32) -> (i32, i32) {
    %c0_i32 = arith.constant 0 : i32
    %c0_i32_0 = arith.constant 0 : i32
    return %arg0, %c0_i32 : i32, i32
  }
}

</mosaic_0001>

<bundles_post_ra>
// kernel: bert_classifier_forward.1
= control target key start
LH: loop header
LB: loop body
LE: loop exit
PB: predicated region body
PF: predicated region fallthrough
CT: control target
= control target key end

     0   :  { %8 = vsyncpa [#allocation3], 0  ;;  %s260_s0 = inlined_call_operand.hbm [shape: f32[16,32], index: 0, kind: input, shape index: {}]   ;;  %s261_s1 = inlined_call_operand.hbm [shape: f32[32,128], index: 1, kind: input, shape index: {}]   ;;  %s262_s2 = inlined_call_operand.vmem [shape: f32[1,128], index: 2, kind: input, shape index: {}]   ;;  %s263_s3 = inlined_call_operand.vmem [shape: f32[16,128], index: 3, kind: output, shape index: {}]  }
   0x1   :  { %9 = vsyncpa [#allocation5], 0  ;;  %s219_s12 = smov [#allocation2]  }
   0x2   :  { %s15_s13 = sshll.u32 %s219_s12, 4  ;;  %s16_s13 = int_to_ptr.vmem [resolvable:$true] %s15_s13 }
   0x3   :  { %s183_s14 = scalar_lea.vmem %s16_s13, 256  ;;  %p188_p1 = scmp.lt.s32.totalorder %s16_s13, %s16_s13 }
   0x4   :  { %p184_p0 = scmp.ne.s32.totalorder %s16_s13, %s183_s14  ;;  %p189_p2 = scmp.lt.s32.totalorder %s183_s14, %s183_s14 }
   0x6   :  { %p190_p3 = por %p189_p2, %p188_p1 }
   0x8   :  { %p191_p4 = pnand %p190_p3, %p184_p0 }
   0xa   :  { %194 = shalt.err (!%p191_p4)
}
   0xb   :  { %s220_s15 = smov 128   ;;  %s221_s16 = smov 8  }
   0xc   :  { %21 = dma.hbm_to_vmem [thread:$0]  %s260_s0, 256, %s16_s13, [#allocation3], %s220_s15, %s220_s15, %s221_s16  }
   0xd   :  { %s222_s19 = smov [#allocation4]  }
   0xe   :  { %s27_s20 = sshll.u32 %s222_s19, 4  ;;  %s28_s20 = int_to_ptr.vmem [resolvable:$true] %s27_s20 }
   0xf   :  { %s203_s21 = scalar_lea.vmem %s28_s20, 512  ;;  %p208_p6 = scmp.lt.s32.totalorder %s28_s20, %s28_s20 }
  0x10   :  { %p204_p5 = scmp.ne.s32.totalorder %s28_s20, %s203_s21  ;;  %p209_p7 = scmp.lt.s32.totalorder %s203_s21, %s203_s21 }
  0x12   :  { %p210_p8 = por %p209_p7, %p208_p6 }
  0x14   :  { %p211_p9 = pnand %p210_p8, %p204_p5 }
  0x16   :  { %214 = shalt.err (!%p211_p9)
}
  0x17   :  { %33 = dma.hbm_to_vmem [thread:$0]  %s261_s1, 512, %s28_s20, [#allocation5], %s220_s15, %s220_s15, %s221_s16  }
  0x18   :  { %215 = dma.done.wait [#allocation3], 256  }
  0x19   :  { %216 = vsyncadd [#allocation3], 4294967040 }
  0x1a   :  { %217 = dma.done.wait [#allocation5], 512  }
  0x1b   :  { %218 = vsyncadd [#allocation5], 4294966784  ;;  %v53_v0 = vld [vmem:[#allocation4 + $0x18] sm:$0xff]  ;;  %v52_v1 = vld [vmem:[#allocation4 + $0x10] sm:$0xff]  ;;  %vm61_vm0 = vcmask 261120  }
  0x1c   :  { %160 = vmatprep.subr.mxu0 %v53_v0  ;;  %v42_v2 = vld [vmem:[#allocation2] sm:$0xff]  ;;  %v43_v3 = vld [vmem:[#allocation2 + $0x8] sm:$0xff]  ;;  %v51_v4 = vld [vmem:[#allocation4 + $0x8] sm:$0xff] }
  0x1d   :  { %161 = vmatpush3.msra.mxu0 %v53_v0  ;;  %vm44_vm1 = vcmp.ge.f32.partialorder %v42_v2, 0.0  ;;  %v46_v5 = vmul.f32 0.01, %v42_v2  ;;  %v47_v6 = vmul.f32 0.01, %v43_v3  ;;  %vm45_vm2 = vcmp.ge.f32.partialorder %v43_v3, 0.0 }
  0x1e   :  { %162 = vmatprep.subr.mxu0 %v52_v1  ;;  %v50_v7 = vld [vmem:[#allocation4] sm:$0xff]  ;;  %v151_v10 = vld [vmem:[%s262_s2] ss:$0 sm:$0xff] }
  0x1f   :  { %163 = vmatpush3.msra.mxu0 %v52_v1  ;;  %v48_v8 = vsel %vm44_vm1, %v42_v2, %v46_v5  ;;  %v49_v9 = vsel %vm45_vm2, %v43_v3, %v47_v6 }
  0x20   :  { %164 = vmatprep.subr.mxu0 %v51_v4  ;;  %168 = vmatprep.mubr.msk.f32.mxu0 %vm61_vm0, %v48_v8 }
  0x21   :  { %165 = vmatpush3.msra.mxu0 %v51_v4 }
  0x22   :  { %166 = vmatprep.subr.mxu0 %v50_v7 }
  0x23   :  { %167 = vmatpush3.msra.mxu0 %v50_v7 }
  0x24   :  { %169 = vmatmul.mubr.msk.f32.vlgmr.msra.gmra.mxu0 %vm61_vm0, %v49_v9 }
  0xe4   :  { %v170_v11 = vpop.f32.mrf.mxu0 }
  0xe5   :  { %v140_v12 = vadd.f32 %v170_v11, %v151_v10 }
  0xe6   :  { %v134_v13 = vpop.f32.mrf.mxu0 }
  0xe7   :  { %144 = vst [vmem:[%s263_s3 + $0x8] sm:$0xff] %v140_v12  ;;  %v135_v14 = vadd.f32 %v151_v10, %v134_v13 }
  0xe9   :  { %143 = vst [vmem:[%s263_s3] sm:$0xff] %v135_v14 }
  0xea   :  { %149 = vsyncpa [#allocation3], 1 }
  0xeb   :  { %150 = vsyncpa [#allocation5], 1 }

</bundles_post_ra>
